<compile_context>
chip_gen: v7x
topology: tpu7x:2x2x1
jax: 0.10.0
libtpu: 0.0.40
codegen_flags: <defaults>
</compile_context>

<pallas_src>
import functools

import jax
import jax.numpy as jnp
from jax.experimental import pallas as pl
from jax.experimental.pallas import tpu as pltpu


def _round_up(x: int, m: int) -> int:
    return (x + m - 1) // m * m


def _round_down_to_128(x: int) -> int:
    return max(128, (x // 128) * 128)


# ---------------------------------------------------------------------------
# Kernels
# ---------------------------------------------------------------------------

def _slp_kernel_multi_k(x_ref, w_ref, o_ref, acc_ref):
    """Tiled y = x @ w with K streamed along the innermost grid axis.

    x_ref:   (tm, tk)   activation tile
    w_ref:   (tk, tn)   weight tile (already transposed to (K, N) at init)
    o_ref:   (tm, tn)   output tile
    acc_ref: (tm, tn)   f32 accumulator, persists across the K grid axis
    """
    k = pl.program_id(2)

    @pl.when(k == 0)
    def _():
        acc_ref[...] = jnp.zeros_like(acc_ref)

    acc_ref[...] += jnp.dot(x_ref[...], w_ref[...],
                            preferred_element_type=jnp.float32)

    @pl.when(k == pl.num_programs(2) - 1)
    def _():
        o_ref[...] = acc_ref[...].astype(o_ref.dtype)


def _slp_kernel_single_k(x_ref, w_ref, o_ref):
    """Fast path when all of K fits in one tile: no scratch, direct store."""
    o_ref[...] = jnp.dot(
        x_ref[...], w_ref[...], preferred_element_type=jnp.float32
    ).astype(o_ref.dtype)


# ---------------------------------------------------------------------------
# Config helpers
# ---------------------------------------------------------------------------

def _vmem_budget_bytes() -> int:
    """Generation-aware scoped-VMEM budget (~75% of physical VMEM)."""
    cap = None
    get_info = getattr(pltpu, "get_tpu_info", None)
    if get_info is not None:
        try:
            cap = int(getattr(get_info(), "vmem_capacity_bytes", 0)) or None
        except Exception:
            cap = None
    if cap is None:
        cap = 64 * 1024 * 1024  # conservative: assume v7x-sized VMEM
    return (cap // 4) * 3       # ~48 MiB on v7x, ~96 MiB on v5e/v6e


def _vmem_need_bytes(tm: int, tn: int, tk: int, itemsize: int) -> int:
    # Double-buffered x / w / out tiles + f32 accumulator scratch.
    return 2 * (tm * tk + tk * tn + tm * tn) * itemsize + tm * tn * 4


# ---------------------------------------------------------------------------
# Jitted forward implementation
# ---------------------------------------------------------------------------

@functools.partial(
    jax.jit,
    static_argnames=("batch", "out_size", "tm", "tn", "tk",
                     "Mp", "Np", "Kp", "vmem_limit", "compute_dtype_name"))
def _slpnet_forward_impl(x2d, w_prepared, *, batch, out_size, tm, tn, tk,
                         Mp, Np, Kp, vmem_limit, compute_dtype_name):
    compute_dtype = jnp.dtype(compute_dtype_name)
    out_dtype = x2d.dtype
    in_size = x2d.shape[1]

    xc = x2d.astype(compute_dtype)          # no-op when dtypes already match
    if (Mp, Kp) != (batch, in_size):        # pad only when actually needed
        xc = jnp.pad(xc, ((0, Mp - batch), (0, Kp - in_size)))

    n_k = Kp // tk
    itemsize = compute_dtype.itemsize
    out_itemsize = jnp.dtype(out_dtype).itemsize
    # Truthful HBM traffic: x re-read once per N tile, w once per M tile.
    cost = pl.CostEstimate(
        flops=2 * Mp * Np * Kp,
        bytes_accessed=Mp * Kp * itemsize * (Np // tn)
        + Kp * Np * itemsize * (Mp // tm)
        + Mp * Np * out_itemsize,
        transcendentals=0,
    )

    if n_k == 1:
        y_p = pl.pallas_call(
            _slp_kernel_single_k,
            out_shape=jax.ShapeDtypeStruct((Mp, Np), out_dtype),
            grid_spec=pltpu.PrefetchScalarGridSpec(
                num_scalar_prefetch=0,
                grid=(Mp // tm, Np // tn),
                in_specs=[
                    pl.BlockSpec((tm, Kp), lambda i, j: (i, 0)),   # x tile
                    pl.BlockSpec((Kp, tn), lambda i, j: (0, j)),   # w tile
                ],
                out_specs=pl.BlockSpec((tm, tn), lambda i, j: (i, j)),
            ),
            compiler_params=pltpu.CompilerParams(
                dimension_semantics=("parallel", "parallel"),
                vmem_limit_bytes=vmem_limit,
            ),
            cost_estimate=cost,
        )(xc, w_prepared)
    else:
        y_p = pl.pallas_call(
            _slp_kernel_multi_k,
            out_shape=jax.ShapeDtypeStruct((Mp, Np), out_dtype),
            grid_spec=pltpu.PrefetchScalarGridSpec(
                num_scalar_prefetch=0,
                grid=(Mp // tm, Np // tn, n_k),
                in_specs=[
                    pl.BlockSpec((tm, tk), lambda i, j, k: (i, k)),  # x tile
                    pl.BlockSpec((tk, tn), lambda i, j, k: (k, j)),  # w tile
                ],
                out_specs=pl.BlockSpec((tm, tn), lambda i, j, k: (i, j)),
                scratch_shapes=[pltpu.VMEM((tm, tn), jnp.float32)],
            ),
            compiler_params=pltpu.CompilerParams(
                dimension_semantics=("parallel", "parallel", "arbitrary"),
                vmem_limit_bytes=vmem_limit,
            ),
            cost_estimate=cost,
        )(xc, w_prepared)

    if (Mp, Np) != (batch, out_size):       # slice only when we padded
        y_p = y_p[:batch, :out_size]
    return y_p


# ---------------------------------------------------------------------------
# Module wrapper (mirrors the PyTorch SLPNet)
# ---------------------------------------------------------------------------

class SLPNetPallas:
    """Pallas TPU equivalent of PyTorch SLPNet: y = x @ weight.T (no bias).

    `weight` is given in native PyTorch nn.Linear layout (out, in); it is
    cast / transposed / padded exactly once here, outside the forward path.
    """

    def __init__(self, weight, *, compute_dtype=None,
                 tm_max=256, tn_max=1024, tk_max=1024):
        weight = jnp.asarray(weight)
        out_size, in_size = weight.shape
        # Default keeps the weight dtype (exact vs. the PyTorch reference).
        # Pass compute_dtype=jnp.bfloat16 on v6e/v7x for ~2x weight bandwidth
        # (f32 accumulation is kept either way; tolerance changes for callers).
        compute_dtype = jnp.dtype(weight.dtype if compute_dtype is None
                                  else compute_dtype)
        itemsize = compute_dtype.itemsize

        self.in_size = int(in_size)
        self.out_size = int(out_size)
        self.compute_dtype = compute_dtype
        self.m_align = max(8, 32 // itemsize)   # 8 f32 / 16 bf16 / 32 int8
        self.tm_max = _round_up(tm_max, self.m_align)

        # ---- generation-aware tile selection (batch-independent part) -----
        budget = _vmem_budget_bytes()
        Kp = _round_up(self.in_size, 128)
        Np = _round_up(self.out_size, 128)
        tn = min(tn_max, Np)
        tk = min(tk_max, Kp)
        while (_vmem_need_bytes(self.tm_max, tn, tk, itemsize) > budget
               and (tk > 128 or tn > 128)):
            if tk >= tn and tk > 128:
                tk = _round_down_to_128(tk // 2)
            else:
                tn = _round_down_to_128(tn // 2)
        Kp = _round_up(Kp, tk)
        Np = _round_up(Np, tn)

        self.tn, self.tk = int(tn), int(tk)
        self.Kp, self.Np = int(Kp), int(Np)
        self.vmem_limit = int(budget)

        # ---- one-time weight prep: cast + transpose to (K, N) + pad -------
        w_t = weight.astype(compute_dtype).T            # (in_size, out_size)
        if (self.Kp, self.Np) != (self.in_size, self.out_size):
            w_t = jnp.pad(w_t, ((0, self.Kp - self.in_size),
                                (0, self.Np - self.out_size)))
        self.w_prepared = jax.device_put(w_t)

    def __call__(self, x):
        x = jnp.asarray(x)
        assert x.shape[-1] == self.in_size
        lead = x.shape[:-1]
        x2d = x.reshape(-1, self.in_size)
        batch = int(x2d.shape[0])

        Mp = _round_up(max(batch, 1), self.m_align)
        tm = min(self.tm_max, Mp)
        Mp = _round_up(Mp, tm)

        # v7x megacore: if the grid would collapse to a single (M, N) tile,
        # halve the N tile (when it stays 128-aligned) so both TensorCores
        # get work.  Harmless on single-TC v5e/v6e (weight traffic unchanged).
        tn = self.tn
        if Mp // tm == 1 and self.Np // tn == 1 and tn % 256 == 0:
            tn //= 2

        y2d = _slpnet_forward_impl(
            x2d, self.w_prepared,
            batch=batch, out_size=self.out_size,
            tm=int(tm), tn=int(tn), tk=self.tk,
            Mp=int(Mp), Np=self.Np, Kp=self.Kp,
            vmem_limit=self.vmem_limit,
            compute_dtype_name=self.compute_dtype.name,
        )
        return y2d.reshape(*lead, self.out_size)


if __name__ == "__main__":
    key = jax.random.PRNGKey(0)
    kx, kw, kx2, kw2 = jax.random.split(key, 4)

    # --- small shape matching the original task (single-K fast path) -------
    batch, input_size, output_size = 8, 32, 16
    # nn.init.normal_(weight, 0.0, 1.0) -> standard normal weight init.
    x = jax.random.normal(kx, (batch, input_size), dtype=jnp.float32)
    weight = jax.random.normal(kw, (output_size, input_size), dtype=jnp.float32)

    net = SLPNetPallas(weight)          # one-time weight cast/transpose/pad
    y = net(x)
    jax.block_until_ready(y)

    y_ref = x @ weight.T
    assert y.shape == (batch, output_size)
    assert jnp.allclose(y, y_ref, atol=1e-5, rtol=1e-5)

    # --- second shape: exercises the multi-K accumulator path + N-tile split
    b2, in2, out2 = 32, 1152, 256
    x2 = jax.random.normal(kx2, (b2, in2), dtype=jnp.float32)
    w2 = jax.random.normal(kw2, (out2, in2), dtype=jnp.float32)
    net2 = SLPNetPallas(w2)
    y2 = net2(x2)
    jax.block_until_ready(y2)

    y2_ref = jnp.matmul(x2, w2.T, precision=jax.lax.Precision.HIGHEST)
    assert y2.shape == (b2, out2)
    assert jnp.allclose(y2, y2_ref, atol=1e-3, rtol=1e-3)

    print("KERNEL_OK")
</pallas_src>

<mosaic_0001>
module attributes {stable_mosaic.version = 11 : i64} {
  func.func @_slp_kernel_single_k(%arg0: i32, %arg1: i32, %arg2: memref<8x128xf32, #tpu.memory_space<vmem>>, %arg3: memref<128x128xf32, #tpu.memory_space<vmem>>, %arg4: memref<8x128xf32, #tpu.memory_space<vmem>>) attributes {dimension_semantics = [#tpu.dimension_semantics<parallel>, #tpu.dimension_semantics<parallel>], iteration_bounds = array<i64: 1, 1>, scalar_prefetch = 0 : i64, scratch_operands = 0 : i64, tpu.core_type = #tpu.core_type<tc>, window_params = [{transform_indices = @transform_0, window_bounds = array<i64: 8, 128>}, {transform_indices = @transform_1, window_bounds = array<i64: 128, 128>}, {transform_indices = @transform_2, window_bounds = array<i64: 8, 128>}]} {
    %c0 = arith.constant 0 : index
    %c0_0 = arith.constant 0 : index
    %0 = vector.load %arg2[%c0, %c0_0] : memref<8x128xf32, #tpu.memory_space<vmem>>, vector<8x128xf32>
    %c0_1 = arith.constant 0 : index
    %c0_2 = arith.constant 0 : index
    %1 = vector.load %arg3[%c0_1, %c0_2] : memref<128x128xf32, #tpu.memory_space<vmem>>, vector<128x128xf32>
    %cst = arith.constant dense<0.000000e+00> : vector<8x128xf32>
    %2 = tpu.matmul %0, %1, %cst {dimension_numbers = #tpu.dot_dimension_numbers<[1], [0], [0], [1], [0, 0, 1, 1], [], []>} : vector<8x128xf32>, vector<128x128xf32>, vector<8x128xf32> -> vector<8x128xf32>
    %c0_3 = arith.constant 0 : index
    %c0_4 = arith.constant 0 : index
    %3 = vector.load %arg4[%c0_3, %c0_4] : memref<8x128xf32, #tpu.memory_space<vmem>>, vector<8x128xf32>
    tpu.vector_store %arg4[%c0_3, %c0_4], %2 {strides = array<i32>} : memref<8x128xf32, #tpu.memory_space<vmem>>, vector<8x128xf32>,
    return
  }
  func.func @transform_0(%arg0: i32, %arg1: i32) -> (i32, i32) {
    %c0_i32 = arith.constant 0 : i32
    %c0_i32_0 = arith.constant 0 : i32
    return %arg0, %c0_i32 : i32, i32
  }
  func.func @transform_1(%arg0: i32, %arg1: i32) -> (i32, i32) {
    %c0_i32 = arith.constant 0 : i32
    %c0_i32_0 = arith.constant 0 : i32
    return %c0_i32, %arg1 : i32, i32
  }
  func.func @transform_2(%arg0: i32, %arg1: i32) -> (i32, i32) {
    %c0_i32 = arith.constant 0 : i32
    return %arg0, %arg1 : i32, i32
  }
}

</mosaic_0001>

<bundles_post_ra>
// kernel: _slpnet_forward_impl.1
= control target key start
LH: loop header
LB: loop body
LE: loop exit
PB: predicated region body
PF: predicated region fallthrough
CT: control target
= control target key end

     0   :  { %7 = vsyncpa [#allocation3], 0  ;;  %s309_s0 = inlined_call_operand.vmem [shape: f32[8,128], index: 0, kind: input, shape index: {}]   ;;  %s310_s1 = inlined_call_operand.hbm [shape: f32[128,128], index: 1, kind: input, shape index: {}]   ;;  %s311_s2 = inlined_call_operand.hbm [shape: f32[8,128], index: 2, kind: output, shape index: {}]  }
   0x1   :  { %8 = vsyncpa [#allocation4], 0  ;;  %s260_s9 = smov [#allocation2]   ;;  %s212_s13 = scalar_lea.hbm %s310_s1, 2048 }
   0x2   :  { %s16_s10 = sshll.u32 %s260_s9, 4  ;;  %p213_p0 = scmp.ne.s32.totalorder %s310_s1, %s212_s13  ;;  %s17_s10 = int_to_ptr.vmem [resolvable:$true] %s16_s10 }
   0x3   :  { %p216_p1 = scmp.lt.u32.totalorder %s212_s13, %s310_s1 }
   0x5   :  { %p218_p2 = pnand %p216_p1, %p213_p0 }
   0x7   :  { %221 = shalt.err (!%p218_p2)
}
   0x8   :  { %s222_s18 = scalar_lea.vmem %s17_s10, 2048  ;;  %p227_p4 = scmp.lt.s32.totalorder %s17_s10, %s17_s10 }
   0x9   :  { %p223_p3 = scmp.ne.s32.totalorder %s17_s10, %s222_s18  ;;  %p228_p5 = scmp.lt.s32.totalorder %s222_s18, %s222_s18 }
   0xb   :  { %p229_p6 = por %p228_p5, %p227_p4 }
   0xd   :  { %p230_p7 = pnand %p229_p6, %p223_p3 }
   0xf   :  { %233 = shalt.err (!%p230_p7)
}
  0x10   :  { %s261_s19 = smov 128   ;;  %s262_s20 = smov 8  }
  0x11   :  { %22 = dma.hbm_to_vmem [thread:$0]  %s310_s1, 2048, %s17_s10, [#allocation3], %s261_s19, %s261_s19, %s262_s20  }
  0x12   :  { %256 = dma.done.wait [#allocation3], 2048  }
  0x13   :  { %257 = vsyncadd [#allocation3], 4294965248  ;;  %v263_v0 = vmov 0.0|0.0   ;;  %vm264_vm0 = vmmov 0   ;;  %v265_v1 = vmov 0.0   ;;  %v27_v2 = vld [vmem:[#allocation2] sm:$0xff] }
  0x14   :  { %181 = vmatprep.subr.bf16.mxu0 %v263_v0  ;;  %178 = vmatprep.mubr.msk.f32.mxu0 %vm264_vm0, %v265_v1  ;;  %v28_v3 = vld [vmem:[#allocation2 + $0x8] sm:$0xff]  ;;  %v29_v4 = vld [vmem:[#allocation2 + $0x10] sm:$0xff]  ;;  %v30_v6 = vld [vmem:[#allocation2 + $0x18] sm:$0xff]  ;;  %s266_s24 = smov [#allocation5]  }
  0x15   :  { %v182_v5 = vpack.c.bf16 %v28_v3, %v27_v2  ;;  %v185_v7 = vpack.c.bf16 %v30_v6, %v29_v4  ;;  %v31_v8 = vld [vmem:[#allocation2 + $0x20] sm:$0xff]  ;;  %v32_v9 = vld [vmem:[#allocation2 + $0x28] sm:$0xff]  ;;  %v33_v11 = vld [vmem:[#allocation2 + $0x30] sm:$0xff]  ;;  %s120_s25 = sshll.u32 %s266_s24, 4  ;;  %s121_s25 = int_to_ptr.vmem [resolvable:$true] %s120_s25 }
  0x16   :  { %v188_v10 = vpack.c.bf16 %v32_v9, %v31_v8  ;;  %v34_v12 = vld [vmem:[#allocation2 + $0x38] sm:$0xff]  ;;  %v35_v14 = vld [vmem:[#allocation2 + $0x40] sm:$0xff]  ;;  %v36_v15 = vld [vmem:[#allocation2 + $0x48] sm:$0xff]  ;;  %s234_s26 = scalar_lea.vmem %s121_s25, 128  ;;  %p239_p9 = scmp.lt.s32.totalorder %s121_s25, %s121_s25 }
  0x17   :  { %183 = vmatpush3.bf16.msra.mxu0 %v182_v5  ;;  %v191_v13 = vpack.c.bf16 %v34_v12, %v33_v11  ;;  %v194_v16 = vpack.c.bf16 %v36_v15, %v35_v14  ;;  %v37_v17 = vld [vmem:[#allocation2 + $0x50] sm:$0xff]  ;;  %v38_v18 = vld [vmem:[#allocation2 + $0x58] sm:$0xff]  ;;  %v39_v20 = vld [vmem:[#allocation2 + $0x60] sm:$0xff]  ;;  %p235_p8 = scmp.ne.s32.totalorder %s121_s25, %s234_s26  ;;  %p240_p10 = scmp.lt.s32.totalorder %s234_s26, %s234_s26 }
  0x18   :  { %184 = vmatprep.subr.bf16.mxu0 %v263_v0  ;;  %v197_v19 = vpack.c.bf16 %v38_v18, %v37_v17  ;;  %v40_v21 = vld [vmem:[#allocation2 + $0x68] sm:$0xff]  ;;  %v41_v23 = vld [vmem:[#allocation2 + $0x70] sm:$0xff]  ;;  %v42_v24 = vld [vmem:[#allocation2 + $0x78] sm:$0xff] }
  0x19   :  { %v200_v22 = vpack.c.bf16 %v40_v21, %v39_v20  ;;  %v203_v25 = vpack.c.bf16 %v42_v24, %v41_v23  ;;  %v26_v26 = vld [vmem:[%s309_s0] sm:$0xff]  ;;  %p241_p11 = por %p240_p10, %p239_p9 }
  0x1b   :  { %186 = vmatpush3.bf16.msra.mxu0 %v185_v7  ;;  %p242_p12 = pnand %p241_p11, %p235_p8 }
  0x1c   :  { %187 = vmatprep.subr.bf16.mxu0 %v263_v0 }
  0x1f   :  { %189 = vmatpush3.bf16.msra.mxu0 %v188_v10 }
  0x20   :  { %190 = vmatprep.subr.bf16.mxu0 %v263_v0 }
  0x23   :  { %192 = vmatpush3.bf16.msra.mxu0 %v191_v13 }
  0x24   :  { %193 = vmatprep.subr.bf16.mxu0 %v263_v0 }
  0x27   :  { %195 = vmatpush3.bf16.msra.mxu0 %v194_v16 }
  0x28   :  { %196 = vmatprep.subr.bf16.mxu0 %v263_v0 }
  0x2b   :  { %198 = vmatpush3.bf16.msra.mxu0 %v197_v19 }
  0x2c   :  { %199 = vmatprep.subr.bf16.mxu0 %v263_v0 }
  0x2f   :  { %201 = vmatpush3.bf16.msra.mxu0 %v200_v22 }
  0x30   :  { %202 = vmatprep.subr.bf16.mxu0 %v263_v0 }
  0x33   :  { %204 = vmatpush3.bf16.msra.mxu0 %v203_v25 }
  0x36   :  { %179 = vmatmul.mubr.f32.vlgmr.msra.gmra.mrb[0].mxu0 %v26_v26 }
 0x109   :  { %v109_v27 = vpop.f32.mrb[0].mxu0 }
 0x10a   :  { %113 = vst [vmem:[#allocation5] sm:$0xff] %v109_v27  ;;  %v180_v28 = vpop.f32.mrb[1].mxu0 }
 0x10b   :  { %245 = shalt.err (!%p242_p12)
}
 0x10c   :  { %s246_s29 = scalar_lea.hbm %s311_s2, 128 }
 0x10d   :  { %p247_p13 = scmp.ne.s32.totalorder %s311_s2, %s246_s29  ;;  %p250_p0 = scmp.lt.u32.totalorder %s246_s29, %s311_s2 }
 0x10f   :  { %p252_p1 = pnand %p250_p0, %p247_p13 }
 0x111   :  { %255 = shalt.err (!%p252_p1)
}
 0x112   :  { %123 = dma.vmem_to_hbm [thread:$0]  %s121_s25, 128, %s311_s2, [#allocation4]  }
 0x113   :  { %258 = dma.done.wait [#allocation4], 128  }
 0x114   :  { %259 = vsyncadd [#allocation4], 4294967168 }
 0x115   :  { %127 = vsyncpa [#allocation3], 1 }
 0x116   :  { %128 = vsyncpa [#allocation4], 1 }

</bundles_post_ra>
